<compile_context>
chip_gen: v7x
topology: tpu7x:2x2x1
jax: 0.10.0
libtpu: 0.0.40
codegen_flags: <defaults>
</compile_context>

<pallas_src>
import functools

import jax
import jax.numpy as jnp
from jax.experimental import pallas as pl
from jax.experimental.pallas import tpu as pltpu

_EPS = 1e-5
_VMEM_LIMIT = 32 * 1024 * 1024  # safe on v5e/v6e (128 MiB) and v7x (64 MiB)


def _round_up(x, m):
    return (x + m - 1) // m * m


# ----------------------------------------------------------------------------
# Kernel 1 (small-M path): fully fused conv-as-matmul + BatchNorm + ReLU.
# ----------------------------------------------------------------------------
def _fused_conv_bn_relu_kernel(w_ref, p_ref, o_ref, *, inv_m):
    # w_ref: (Cp, Kp) bf16   p_ref: (Kp, M) bf16   o_ref: (Cp, M) f32
    y = jnp.dot(w_ref[...], p_ref[...], preferred_element_type=jnp.float32)
    s = jnp.sum(y, axis=1, keepdims=True)            # per-channel sum
    ss = jnp.sum(y * y, axis=1, keepdims=True)       # per-channel sum of squares
    mean = s * inv_m
    var = ss * inv_m - mean * mean                   # biased variance
    inv = jax.lax.rsqrt(var + _EPS)
    o_ref[...] = jnp.maximum((y - mean) * inv, 0.0)


def _run_fused(w2d, patches_t):
    cp, kp = w2d.shape
    _, m = patches_t.shape
    kernel = functools.partial(_fused_conv_bn_relu_kernel, inv_m=1.0 / m)
    return pl.pallas_call(
        kernel,
        out_shape=jax.ShapeDtypeStruct((cp, m), jnp.float32),
        grid=(1,),
        in_specs=[
            pl.BlockSpec((cp, kp), lambda i: (0, 0)),
            pl.BlockSpec((kp, m), lambda i: (0, 0)),
        ],
        out_specs=pl.BlockSpec((cp, m), lambda i: (0, 0)),
        compiler_params=pltpu.CompilerParams(
            dimension_semantics=("arbitrary",),
            vmem_limit_bytes=_VMEM_LIMIT),
    )(w2d, patches_t)


# ----------------------------------------------------------------------------
# Kernels 2a/2b (large-M path): M-tiled two-pass BN.
#   2a: conv per M tile + global sum/sumsq accumulation (resident outputs).
#   2b: per-tile normalize + ReLU using the global stats.
# ----------------------------------------------------------------------------
def _conv_stats_kernel(w_ref, p_ref, y_ref, sum_ref, ssq_ref):
    i = pl.program_id(0)

    @pl.when(i == 0)
    def _():
        sum_ref[...] = jnp.zeros_like(sum_ref)
        ssq_ref[...] = jnp.zeros_like(ssq_ref)

    y = jnp.dot(w_ref[...], p_ref[...], preferred_element_type=jnp.float32)
    y_ref[...] = y
    # Stats must be accumulated over ALL M rows before normalizing.
    sum_ref[...] += jnp.sum(y, axis=1, keepdims=True)
    ssq_ref[...] += jnp.sum(y * y, axis=1, keepdims=True)


def _bn_relu_kernel(sum_ref, ssq_ref, y_ref, o_ref, *, inv_m):
    mean = sum_ref[...] * inv_m                      # (Cp, 1)
    var = ssq_ref[...] * inv_m - mean * mean
    inv = jax.lax.rsqrt(var + _EPS)
    o_ref[...] = jnp.maximum((y_ref[...] - mean) * inv, 0.0)


def _run_tiled(w2d, patches_t, tile_m):
    cp, kp = w2d.shape
    _, m = patches_t.shape
    mt = m // tile_m

    y, ysum, yssq = pl.pallas_call(
        _conv_stats_kernel,
        out_shape=(
            jax.ShapeDtypeStruct((cp, m), jnp.float32),
            jax.ShapeDtypeStruct((cp, 1), jnp.float32),
            jax.ShapeDtypeStruct((cp, 1), jnp.float32),
        ),
        grid=(mt,),
        in_specs=[
            pl.BlockSpec((cp, kp), lambda i: (0, 0)),
            pl.BlockSpec((kp, tile_m), lambda i: (0, i)),
        ],
        out_specs=(
            pl.BlockSpec((cp, tile_m), lambda i: (0, i)),
            pl.BlockSpec((cp, 1), lambda i: (0, 0)),   # resident accumulator
            pl.BlockSpec((cp, 1), lambda i: (0, 0)),   # resident accumulator
        ),
        compiler_params=pltpu.CompilerParams(
            # stats accumulate across the M axis -> must stay "arbitrary"
            dimension_semantics=("arbitrary",),
            vmem_limit_bytes=_VMEM_LIMIT),
    )(w2d, patches_t)

    kernel = functools.partial(_bn_relu_kernel, inv_m=1.0 / m)
    return pl.pallas_call(
        kernel,
        out_shape=jax.ShapeDtypeStruct((cp, m), jnp.float32),
        grid=(mt,),
        in_specs=[
            pl.BlockSpec((cp, 1), lambda i: (0, 0)),
            pl.BlockSpec((cp, 1), lambda i: (0, 0)),
            pl.BlockSpec((cp, tile_m), lambda i: (0, i)),
        ],
        out_specs=pl.BlockSpec((cp, tile_m), lambda i: (0, i)),
        compiler_params=pltpu.CompilerParams(
            # independent tiles -> shard across v7x's 2 TensorCores
            dimension_semantics=("parallel",),
            vmem_limit_bytes=_VMEM_LIMIT),
    )(ysum, yssq, y)


# ----------------------------------------------------------------------------
# Wrapper: reflect pad + transposed im2col + fused launch + NCHW plumbing.
# ----------------------------------------------------------------------------
# TODO(synk): at production sizes, extract patches inside the kernel from an
# NHWC VMEM-resident input with strided pl.ds reads instead of materializing
# the KH*KW-times-inflated im2col matrix in HBM.
def _im2col_t(x_pad, kh, kw, stride):
    # x_pad: (N, C, Hp, Wp) -> patches^T (C*kh*kw, N*OH*OW), K ordered (c,kh,kw)
    n, c, hp, wp = x_pad.shape
    oh = (hp - kh) // stride + 1
    ow = (wp - kw) // stride + 1
    cols = []
    for i in range(kh):
        for j in range(kw):
            cols.append(
                x_pad[:, :, i:i + stride * oh:stride, j:j + stride * ow:stride])
    p = jnp.stack(cols, axis=2)            # (N, C, kh*kw, OH, OW)
    p = p.transpose(1, 2, 0, 3, 4)         # (C, kh*kw, N, OH, OW)
    p = p.reshape(c * kh * kw, n * oh * ow)
    return p, oh, ow


@functools.partial(jax.jit, static_argnames=("stride", "padding", "tile_m"))
def ffc_bn_act_local2global(x, w_l2l, w_l2g, stride=1, padding=0, tile_m=512):
    n, c, _, _ = x.shape
    out_cl = w_l2l.shape[0]
    out_cg = w_l2g.shape[0]
    kh, kw = w_l2l.shape[2], w_l2l.shape[3]

    # One reflect pad + one im2col shared by BOTH branches (branch fusion).
    x_pad = jnp.pad(
        x, ((0, 0), (0, 0), (padding, padding), (padding, padding)),
        mode="reflect")
    patches_t, oh, ow = _im2col_t(x_pad, kh, kw, stride)    # (K, M)
    k, m = patches_t.shape

    # Fuse the two convs into one matmul by concatenating output channels.
    cout = out_cl + out_cg
    w_all = jnp.concatenate([w_l2l, w_l2g], axis=0)         # (Cout, C, KH, KW)
    w2d = w_all.reshape(cout, k)                            # K order = (c,kh,kw)

    # Alignment padding (zero rows/cols, mathematically a no-op).
    kp = _round_up(k, 128)
    cp = _round_up(cout, 8)
    patches_t = jnp.pad(patches_t, ((0, kp - k), (0, 0)))
    w2d = jnp.pad(w2d, ((0, cp - cout), (0, kp - k)))

    # bf16 MXU operands, f32 accumulation (set inside the kernels).
    patches_t = patches_t.astype(jnp.bfloat16)
    w2d = w2d.astype(jnp.bfloat16)

    if m > tile_m and m % tile_m == 0:
        y = _run_tiled(w2d, patches_t, tile_m)   # pipelined M tiles, 2-pass BN
    else:
        y = _run_fused(w2d, patches_t)           # single >=M-row tile: fully fused

    # (Cp, M) lane-dense result -> NCHW, split back into local/global branches.
    out = y.reshape(cp, n, oh, ow).transpose(1, 0, 2, 3)
    return out[:, :out_cl], out[:, out_cl:cout]


# ----------------------------------------------------------------------------
# Pure-JAX f32 reference (for correctness check)
# ----------------------------------------------------------------------------
def _ref_branch(x, w, stride, padding, eps=_EPS):
    x_pad = jnp.pad(
        x, ((0, 0), (0, 0), (padding, padding), (padding, padding)),
        mode="reflect")
    y = jax.lax.conv_general_dilated(
        x_pad, w, (stride, stride), "VALID",
        dimension_numbers=("NCHW", "OIHW", "NCHW"))
    mu = y.mean(axis=(0, 2, 3), keepdims=True)
    var = ((y - mu) ** 2).mean(axis=(0, 2, 3), keepdims=True)
    return jnp.maximum((y - mu) / jnp.sqrt(var + eps), 0.0)


# ----------------------------------------------------------------------------
if __name__ == "__main__":
    # Module config: in_channels=4, out_channels=8, kernel_size=3, stride=1,
    # padding=1, bias=False, ratio_gout=0.75 -> out_cl=2, out_cg=6
    in_channels, out_channels = 4, 8
    kernel_size, stride, padding = 3, 1, 1
    ratio_gout = 0.75
    out_cl = int(out_channels * (1 - ratio_gout))   # 2
    out_cg = int(out_channels * ratio_gout)         # 6

    key = jax.random.PRNGKey(0)
    kx, kl, kg = jax.random.split(key, 3)
    x = jax.random.normal(kx, (2, in_channels, 16, 16), jnp.float32)
    w_l2l = 0.1 * jax.random.normal(
        kl, (out_cl, in_channels, kernel_size, kernel_size), jnp.float32)
    w_l2g = 0.1 * jax.random.normal(
        kg, (out_cg, in_channels, kernel_size, kernel_size), jnp.float32)

    # Main run (M = 2*16*16 = 512 -> single fused >=512-row tile).
    x_l, x_g = ffc_bn_act_local2global(x, w_l2l, w_l2g, stride, padding)
    x_l = jax.block_until_ready(x_l)
    x_g = jax.block_until_ready(x_g)
    assert x_l.shape == (2, out_cl, 16, 16) and x_g.shape == (2, out_cg, 16, 16)

    # Correctness vs f32 reference (loose tolerance: bf16 MXU operands).
    ref_l = _ref_branch(x, w_l2l, stride, padding)
    ref_g = _ref_branch(x, w_l2g, stride, padding)
    assert jnp.allclose(x_l, ref_l, atol=5e-2, rtol=5e-2)
    assert jnp.allclose(x_g, ref_g, atol=5e-2, rtol=5e-2)

    # Also exercise the M-tiled two-pass path used for large inputs.
    t_l, t_g = ffc_bn_act_local2global(
        x, w_l2l, w_l2g, stride, padding, tile_m=128)
    t_l = jax.block_until_ready(t_l)
    t_g = jax.block_until_ready(t_g)
    assert jnp.allclose(t_l, x_l, atol=1e-3, rtol=1e-3)
    assert jnp.allclose(t_g, x_g, atol=1e-3, rtol=1e-3)

    print("KERNEL_OK")
</pallas_src>

<mosaic_0001>
module attributes {stable_mosaic.version = 11 : i64} {
  func.func @_fused_conv_bn_relu_kernel(%arg0: i32, %arg1: memref<8x128xbf16, #tpu.memory_space<vmem>>, %arg2: memref<128x512xbf16, #tpu.memory_space<vmem>>, %arg3: memref<8x512xf32, #tpu.memory_space<vmem>>) attributes {dimension_semantics = [#tpu.dimension_semantics<arbitrary>], iteration_bounds = array<i64: 1>, scalar_prefetch = 0 : i64, scratch_operands = 0 : i64, tpu.core_type = #tpu.core_type<tc>, window_params = [{pipeline_mode = #tpu.pipeline_mode<synchronous>, transform_indices = @transform_0, window_bounds = array<i64: 8, 128>}, {pipeline_mode = #tpu.pipeline_mode<synchronous>, transform_indices = @transform_1, window_bounds = array<i64: 128, 512>}, {pipeline_mode = #tpu.pipeline_mode<synchronous>, transform_indices = @transform_2, window_bounds = array<i64: 8, 512>}]} {
    %c0 = arith.constant 0 : index
    %c0_0 = arith.constant 0 : index
    %0 = vector.load %arg1[%c0, %c0_0] : memref<8x128xbf16, #tpu.memory_space<vmem>>, vector<8x128xbf16>
    %c0_1 = arith.constant 0 : index
    %c0_2 = arith.constant 0 : index
    %1 = vector.load %arg2[%c0_1, %c0_2] : memref<128x512xbf16, #tpu.memory_space<vmem>>, vector<128x512xbf16>
    %cst = arith.constant dense<0.000000e+00> : vector<8x512xf32>
    %2 = tpu.matmul %0, %1, %cst {dimension_numbers = #tpu.dot_dimension_numbers<[1], [0], [0], [1], [0, 0, 1, 1], [], []>} : vector<8x128xbf16>, vector<128x512xbf16>, vector<8x512xf32> -> vector<8x512xf32>
    %cst_3 = arith.constant dense<0.000000e+00> : vector<8xf32>
    %3 = vector.multi_reduction <add>, %2, %cst_3 [1] : vector<8x512xf32> to vector<8xf32>
    %4 = vector.shape_cast %3 : vector<8xf32> to vector<8x1xf32>
    %5 = arith.mulf %2, %2 : vector<8x512xf32>
    %cst_4 = arith.constant dense<0.000000e+00> : vector<8xf32>
    %6 = vector.multi_reduction <add>, %5, %cst_4 [1] : vector<8x512xf32> to vector<8xf32>
    %7 = vector.shape_cast %6 : vector<8xf32> to vector<8x1xf32>
    %cst_5 = arith.constant 0.001953125 : f32
    %8 = vector.broadcast %cst_5 : f32 to vector<8x1xf32>
    %9 = arith.mulf %4, %8 : vector<8x1xf32>
    %cst_6 = arith.constant 0.001953125 : f32
    %10 = vector.broadcast %cst_6 : f32 to vector<8x1xf32>
    %11 = arith.mulf %7, %10 : vector<8x1xf32>
    %12 = arith.mulf %9, %9 : vector<8x1xf32>
    %13 = arith.subf %11, %12 : vector<8x1xf32>
    %cst_7 = arith.constant 9.99999974E-6 : f32
    %14 = vector.broadcast %cst_7 : f32 to vector<8x1xf32>
    %15 = arith.addf %13, %14 : vector<8x1xf32>
    %16 = math.rsqrt %15 : vector<8x1xf32>
    %17 = vector.broadcast %9 : vector<8x1xf32> to vector<8x512xf32>
    %18 = arith.subf %2, %17 : vector<8x512xf32>
    %19 = vector.broadcast %16 : vector<8x1xf32> to vector<8x512xf32>
    %20 = arith.mulf %18, %19 : vector<8x512xf32>
    %cst_8 = arith.constant 0.000000e+00 : f32
    %21 = vector.broadcast %cst_8 : f32 to vector<8x512xf32>
    %22 = arith.maximumf %20, %21 : vector<8x512xf32>
    %c0_9 = arith.constant 0 : index
    %c0_10 = arith.constant 0 : index
    %23 = vector.load %arg3[%c0_9, %c0_10] : memref<8x512xf32, #tpu.memory_space<vmem>>, vector<8x512xf32>
    tpu.vector_store %arg3[%c0_9, %c0_10], %22 {strides = array<i32>} : memref<8x512xf32, #tpu.memory_space<vmem>>, vector<8x512xf32>,
    return
  }
  func.func @transform_0(%arg0: i32) -> (i32, i32) {
    %c0_i32 = arith.constant 0 : i32
    %c0_i32_0 = arith.constant 0 : i32
    %c0_i32_1 = arith.constant 0 : i32
    return %c0_i32, %c0_i32_0 : i32, i32
  }
  func.func @transform_1(%arg0: i32) -> (i32, i32) {
    %c0_i32 = arith.constant 0 : i32
    %c0_i32_0 = arith.constant 0 : i32
    %c0_i32_1 = arith.constant 0 : i32
    return %c0_i32, %c0_i32_0 : i32, i32
  }
  func.func @transform_2(%arg0: i32) -> (i32, i32) {
    %c0_i32 = arith.constant 0 : i32
    %c0_i32_0 = arith.constant 0 : i32
    %c0_i32_1 = arith.constant 0 : i32
    return %c0_i32, %c0_i32_0 : i32, i32
  }
}

</mosaic_0001>

<bundles_post_ra>
// kernel: ffc_bn_act_local2global.1
= control target key start
LH: loop header
LB: loop body
LE: loop exit
PB: predicated region body
PF: predicated region fallthrough
CT: control target
= control target key end

     0   :  { %v410_v1 = vmov 0   ;;  %s537_s1 = inlined_call_operand.vmem [shape: bf16[128,512], index: 1, kind: input, shape index: {}]   ;;  %s538_s0 = inlined_call_operand.vmem [shape: bf16[8,128], index: 0, kind: input, shape index: {}]   ;;  %s539_s2 = inlined_call_operand.vmem [shape: f32[8,512], index: 2, kind: output, shape index: {}]  }
   0x1   :  { %v360_v0 = vld [vmem:[%s537_s1 + $0x4] ss:$16 sps:$4 sm:$0xff]   ;;  %237 = vmatprep.mubr.bf16.mxu0 %v410_v1  ;;  %278 = vmatprep.mubr.bf16.mxu1 %v410_v1  ;;  %v362_v2 = vld [vmem:[%s537_s1 + $0xc] ss:$16 sps:$4 sm:$0xff]   ;;  %v364_v3 = vld [vmem:[%s537_s1] ss:$16 sps:$4 sm:$0xff]  }
   0x2   :  { %205 = vmatprep.subr.bf16.mxu0 %v360_v0  ;;  %v365_v4 = vld [vmem:[%s537_s1 + $0x8] ss:$16 sps:$4 sm:$0xff]   ;;  %246 = vmatprep.subr.bf16.mxu1 %v362_v2  ;;  %v366_v5 = vld [vmem:[%s537_s1 + $0x24] ss:$16 sps:$4 sm:$0xff]   ;;  %v368_v6 = vld [vmem:[%s537_s1 + $0x2c] ss:$16 sps:$4 sm:$0xff]  }
   0x3   :  { %206 = vmatpush1.bf16.msra.mxu0 %v364_v3  ;;  %247 = vmatpush1.bf16.msra.mxu1 %v365_v4  ;;  %v370_v7 = vld [vmem:[%s537_s1 + $0x20] ss:$16 sps:$4 sm:$0xff]   ;;  %v371_v8 = vld [vmem:[%s537_s1 + $0x28] ss:$16 sps:$4 sm:$0xff]   ;;  %v372_v9 = vld [vmem:[%s537_s1 + $0x44] ss:$16 sps:$4 sm:$0xff]  }
   0x4   :  { %207 = vmatprep.subr.bf16.mxu0 %v366_v5  ;;  %248 = vmatprep.subr.bf16.mxu1 %v368_v6  ;;  %v374_v10 = vld [vmem:[%s537_s1 + $0x4c] ss:$16 sps:$4 sm:$0xff]   ;;  %v376_v11 = vld [vmem:[%s537_s1 + $0x40] ss:$16 sps:$4 sm:$0xff]   ;;  %v377_v12 = vld [vmem:[%s537_s1 + $0x48] ss:$16 sps:$4 sm:$0xff]  }
   0x5   :  { %v378_v13 = vld [vmem:[%s537_s1 + $0x64] ss:$16 sps:$4 sm:$0xff]   ;;  %v380_v14 = vld [vmem:[%s537_s1 + $0x6c] ss:$16 sps:$4 sm:$0xff]   ;;  %v382_v15 = vld [vmem:[%s537_s1 + $0x60] ss:$16 sps:$4 sm:$0xff]  }
   0x6   :  { %v383_v16 = vld [vmem:[%s537_s1 + $0x68] ss:$16 sps:$4 sm:$0xff]   ;;  %v384_v17 = vld [vmem:[%s537_s1 + $0x84] ss:$16 sps:$4 sm:$0xff]   ;;  %v386_v18 = vld [vmem:[%s537_s1 + $0x8c] ss:$16 sps:$4 sm:$0xff]  }
   0x7   :  { %208 = vmatpush1.bf16.msra.mxu0 %v370_v7  ;;  %249 = vmatpush1.bf16.msra.mxu1 %v371_v8  ;;  %v388_v19 = vld [vmem:[%s537_s1 + $0x80] ss:$16 sps:$4 sm:$0xff]   ;;  %v389_v20 = vld [vmem:[%s537_s1 + $0x88] ss:$16 sps:$4 sm:$0xff]   ;;  %v390_v21 = vld [vmem:[%s537_s1 + $0xa4] ss:$16 sps:$4 sm:$0xff]  }
   0x8   :  { %209 = vmatprep.subr.bf16.mxu0 %v372_v9  ;;  %250 = vmatprep.subr.bf16.mxu1 %v374_v10  ;;  %v392_v22 = vld [vmem:[%s537_s1 + $0xac] ss:$16 sps:$4 sm:$0xff]   ;;  %v394_v23 = vld [vmem:[%s537_s1 + $0xa0] ss:$16 sps:$4 sm:$0xff]   ;;  %v395_v24 = vld [vmem:[%s537_s1 + $0xa8] ss:$16 sps:$4 sm:$0xff]  }
   0x9   :  { %v396_v25 = vld [vmem:[%s537_s1 + $0xc4] ss:$16 sps:$4 sm:$0xff]   ;;  %v398_v26 = vld [vmem:[%s537_s1 + $0xcc] ss:$16 sps:$4 sm:$0xff]   ;;  %v400_v27 = vld [vmem:[%s537_s1 + $0xc0] ss:$16 sps:$4 sm:$0xff]  }
   0xa   :  { %v401_v28 = vld [vmem:[%s537_s1 + $0xc8] ss:$16 sps:$4 sm:$0xff]   ;;  %v402_v29 = vld [vmem:[%s537_s1 + $0xe4] ss:$16 sps:$4 sm:$0xff]   ;;  %v404_v30 = vld [vmem:[%s537_s1 + $0xec] ss:$16 sps:$4 sm:$0xff]  }
   0xb   :  { %210 = vmatpush1.bf16.msra.mxu0 %v376_v11  ;;  %251 = vmatpush1.bf16.msra.mxu1 %v377_v12  ;;  %v406_v31 = vld [vmem:[%s537_s1 + $0xe0] ss:$16 sps:$4 sm:$0xff]   ;;  %v407_v32 = vld [vmem:[%s537_s1 + $0xe8] ss:$16 sps:$4 sm:$0xff]  }
   0xc   :  { %211 = vmatprep.subr.bf16.mxu0 %v378_v13  ;;  %252 = vmatprep.subr.bf16.mxu1 %v380_v14  ;;  %v12_v33 = vld [vmem:[%s538_s0] sm:$0xf] }
   0xf   :  { %212 = vmatpush1.bf16.msra.mxu0 %v382_v15  ;;  %253 = vmatpush1.bf16.msra.mxu1 %v383_v16 }
  0x10   :  { %213 = vmatprep.subr.bf16.mxu0 %v384_v17  ;;  %254 = vmatprep.subr.bf16.mxu1 %v386_v18 }
  0x13   :  { %214 = vmatpush1.bf16.msra.mxu0 %v388_v19  ;;  %255 = vmatpush1.bf16.msra.mxu1 %v389_v20 }
  0x14   :  { %215 = vmatprep.subr.bf16.mxu0 %v390_v21  ;;  %256 = vmatprep.subr.bf16.mxu1 %v392_v22 }
  0x17   :  { %216 = vmatpush1.bf16.msra.mxu0 %v394_v23  ;;  %257 = vmatpush1.bf16.msra.mxu1 %v395_v24 }
  0x18   :  { %217 = vmatprep.subr.bf16.mxu0 %v396_v25  ;;  %258 = vmatprep.subr.bf16.mxu1 %v398_v26 }
  0x1b   :  { %218 = vmatpush1.bf16.msra.mxu0 %v400_v27  ;;  %259 = vmatpush1.bf16.msra.mxu1 %v401_v28 }
  0x1c   :  { %219 = vmatprep.subr.bf16.mxu0 %v402_v29  ;;  %260 = vmatprep.subr.bf16.mxu1 %v404_v30 }
  0x1f   :  { %220 = vmatpush1.bf16.msra.mxu0 %v406_v31  ;;  %261 = vmatpush1.bf16.msra.mxu1 %v407_v32 }
  0x22   :  { %238 = vmatmul.mubr.bf16.vlgmr.msra.gmra.mrb[0].mxu0 %v12_v33  ;;  %279 = vmatmul.mubr.bf16.vlgmr.msra.gmra.mrb[0].mxu1 %v12_v33 }
  0xf5   :  { %v239_v34 = vpop.f32.mrb[0].mxu0  ;;  %v280_v35 = vpop.f32.mrb[0].mxu1 }
  0xf6   :  { %v292_v36 = vmul.f32 %v239_v34, %v239_v34  ;;  %v241_v37 = vpop.f32.mrb[1].mxu0  ;;  %v282_v38 = vpop.f32.mrb[1].mxu1  ;;  %v294_v39 = vmul.f32 %v280_v35, %v280_v35 }
  0xf7   :  { %v287_v40 = vadd.f32 %v241_v37, %v239_v34  ;;  %v293_v41 = vmul.f32 %v241_v37, %v241_v37  ;;  %v243_v42 = vpop.f32.mrb[2].mxu0  ;;  %v284_v43 = vpop.f32.mrb[2].mxu1  ;;  %v295_v49 = vmul.f32 %v282_v38, %v282_v38 }
  0xf8   :  { %v244_v44 = vpop.f32.mrb[3].mxu0  ;;  %v285_v45 = vpop.f32.mrb[3].mxu1 }
  0xf9   :  { %v288_v46 = vadd.f32 %v287_v40, %v280_v35  ;;  %v296_v47 = vadd.f32 %v293_v41, %v292_v36 }
  0xfb   :  { %v289_v48 = vadd.f32 %v288_v46, %v282_v38  ;;  %v297_v50 = vadd.f32 %v296_v47, %v294_v39 }
  0xfd   :  { %290 = vadd.xlane.f32.xlu0 %v289_v48  ;;  %v298_v51 = vadd.f32 %v297_v50, %v295_v49 }
 0x101   :  { %299 = vadd.xlane.f32.xlu0 %v298_v51 }
 0x18a   :  { %v291_v52 = vpop.xlane.xlu0 %290 }
 0x18b   :  { %v301_v53 = vmul.f32 0.001953125, %v291_v52 }
 0x18d   :  { %v303_v55 = vmul.f32 %v301_v53, %v301_v53  ;;  %v307_v59 = vsub.f32 %v239_v34, %v301_v53  ;;  %v308_v60 = vsub.f32 %v241_v37, %v301_v53  ;;  %v309_v61 = vsub.f32 %v280_v35, %v301_v53 }
 0x18e   :  { %v300_v54 = vpop.xlane.xlu0 %299  ;;  %v310_v62 = vsub.f32 %v282_v38, %v301_v53 }
 0x18f   :  { %v302_v56 = vmul.f32 0.001953125, %v300_v54 }
 0x191   :  { %v304_v57 = vsub.f32 %v302_v56, %v303_v55 }
 0x193   :  { %v305_v58 = vadd.f32 1e-05, %v304_v57 }
 0x195   :  { %408 = vrsqrt.f32 %v305_v58 }
 0x19f   :  { %v409_v63 = vpop.eup %408 }
 0x1a0   :  { %v311_v0 = vmul.f32 %v409_v63, %v307_v59  ;;  %v312_v1 = vmul.f32 %v409_v63, %v308_v60  ;;  %v313_v2 = vmul.f32 %v409_v63, %v309_v61  ;;  %v314_v3 = vmul.f32 %v409_v63, %v310_v62 }
 0x1a2   :  { %v315_v4 = vmax.f32 %v311_v0, 0.0  ;;  %v316_v5 = vmax.f32 %v312_v1, 0.0  ;;  %v317_v6 = vmax.f32 %v313_v2, 0.0  ;;  %v318_v7 = vmax.f32 %v314_v3, 0.0 }
 0x1a4   :  { %319 = vst [vmem:[%s539_s2] sm:$0xff] %v315_v4  ;;  %320 = vst [vmem:[%s539_s2 + $0x8] sm:$0xff] %v316_v5 }
 0x1a5   :  { %321 = vst [vmem:[%s539_s2 + $0x10] sm:$0xff] %v317_v6  ;;  %322 = vst [vmem:[%s539_s2 + $0x18] sm:$0xff] %v318_v7 }

</bundles_post_ra>
